<compile_context>
chip_gen: v7x
topology: tpu7x:2x2x1
jax: 0.10.0
libtpu: 0.0.40
codegen_flags: <defaults>
</compile_context>

<pallas_src>
import functools

import jax
import jax.numpy as jnp
from jax import lax
from jax.experimental import pallas as pl
from jax.experimental.pallas import tpu as pltpu


def _pick_vmem_limit():
    # v5e/v6e: 128 MiB physical VMEM -> ~64 MiB scoped; v7x: 64 MiB/TC -> 32 MiB.
    try:
        cap = int(pltpu.get_tpu_info().vmem_capacity_bytes)
        return min(cap // 2, 96 * 1024 * 1024)
    except Exception:
        return 32 * 1024 * 1024


_VMEM_LIMIT = _pick_vmem_limit()


def _log_softmax(x):
    s = x - jnp.max(x, axis=-1, keepdims=True)
    return s - jnp.log(jnp.sum(jnp.exp(s), axis=-1, keepdims=True))


# ----------------------------------------------------------------------------
# Kernel: fused teacher token head + masked token KL + per-batch x column sums
# ----------------------------------------------------------------------------
def _token_distill_kernel(x_ref, w_ref, b_ref, tp_ref, m_ref, kl_ref, xs_ref,
                          *, n_tokens):
    tn = x_ref.shape[0]
    c_in = x_ref.shape[1]

    # Row validity for the (possibly ragged) last token tile.  Pallas does not
    # bounds-check the VMEM window, so tail rows may hold garbage (even NaN);
    # every reduction below excludes them with a select (never a multiply).
    tok_idx = pl.program_id(1) * tn + lax.broadcasted_iota(jnp.int32, (tn, 1), 0)
    valid = tok_idx < n_tokens                                    # (tn, 1) bool

    # --- partial per-batch column sum of x (feeds the teacher cls head) -----
    x_f32 = jnp.where(valid, x_ref[...].astype(jnp.float32), 0.0)
    col_sum = jnp.sum(x_f32, axis=0)                              # (c_in,)
    xs_ref[...] = jnp.broadcast_to(col_sum[None, :], (8, c_in))

    # --- teacher token logits for this tile (bf16 MXU, f32 accumulate) ------
    t = jnp.dot(x_ref[...].astype(jnp.bfloat16), w_ref[...],
                preferred_element_type=jnp.float32) + b_ref[...]

    # --- token KL, algebraically reduced (no lp / p / lt temporaries) -------
    # kl_row = sum_c p * (lt - lp) = (Σ e·st − Σ e·tp)/z − log z + lse(tp)
    st = t - jnp.max(t, axis=-1, keepdims=True)
    e = jnp.exp(st)
    z = jnp.sum(e, axis=-1, keepdims=True)

    tp = tp_ref[...].astype(jnp.float32)
    tp_max = jnp.max(tp, axis=-1, keepdims=True)
    lse_tp = tp_max + jnp.log(jnp.sum(jnp.exp(tp - tp_max), axis=-1,
                                      keepdims=True))

    s_est = jnp.sum(e * st, axis=-1, keepdims=True)
    s_etp = jnp.sum(e * tp, axis=-1, keepdims=True)
    kl_row = (s_est - s_etp) / z - jnp.log(z) + lse_tp            # (tn, 1)

    m = jnp.where(valid, m_ref[...].astype(jnp.float32), 0.0)     # (tn, 1)
    keep = (m > 0.5) & valid
    kl_sum = jnp.sum(jnp.where(keep, kl_row, 0.0))
    keep_cnt = jnp.sum(keep.astype(jnp.float32))
    mask_sum = jnp.sum(m)

    # Lane-dense partial slab: row 0, lanes 0/1/2 = kl, keep-count, mask-sum.
    lane = lax.broadcasted_iota(jnp.int32, (8, 128), 1)
    row = lax.broadcasted_iota(jnp.int32, (8, 128), 0)
    first = row == 0
    kl_ref[...] = jnp.where(first & (lane == 0), kl_sum,
                  jnp.where(first & (lane == 1), keep_cnt,
                  jnp.where(first & (lane == 2), mask_sum, 0.0)))


def fused_token_distill_and_xsum(inputs, w_tok_bf16, b_tok_f32, token_pred,
                                 mask3d, *, block_tokens=512):
    """Returns (kl_sum, keep_count, mask_sum, per_batch_x_column_sum)."""
    B, N, C_IN = inputs.shape
    C = token_pred.shape[-1]

    if N <= block_tokens:
        tn = N                      # single full-width token tile per batch
    else:
        tn = block_tokens           # multiple of 8; ragged tail handled in-kernel
    n_tiles = pl.cdiv(N, tn)

    kernel = functools.partial(_token_distill_kernel, n_tokens=N)

    kl_part, xs_part = pl.pallas_call(
        kernel,
        grid=(B, n_tiles),
        out_shape=(
            jax.ShapeDtypeStruct((B, n_tiles, 8, 128), jnp.float32),
            jax.ShapeDtypeStruct((B, n_tiles, 8, C_IN), jnp.float32),
        ),
        in_specs=[
            pl.BlockSpec((None, tn, C_IN), lambda b, j: (b, j, 0)),   # x tile
            pl.BlockSpec((C_IN, C), lambda b, j: (0, 0)),             # W_tok
            pl.BlockSpec((1, C), lambda b, j: (0, 0)),                # bias
            pl.BlockSpec((None, tn, C), lambda b, j: (b, j, 0)),      # student
            pl.BlockSpec((None, tn, 1), lambda b, j: (b, j, 0)),      # mask col
        ],
        out_specs=(
            pl.BlockSpec((None, None, 8, 128), lambda b, j: (b, j, 0, 0)),
            pl.BlockSpec((None, None, 8, C_IN), lambda b, j: (b, j, 0, 0)),
        ),
        compiler_params=pltpu.CompilerParams(
            dimension_semantics=("parallel", "parallel"),
            vmem_limit_bytes=_VMEM_LIMIT,
        ),
    )(inputs, w_tok_bf16, b_tok_f32, token_pred, mask3d)

    kl_sum = jnp.sum(kl_part[:, :, 0, 0])
    keep_cnt = jnp.sum(kl_part[:, :, 0, 1])
    mask_sum = jnp.sum(kl_part[:, :, 0, 2])
    x_sum = jnp.sum(xs_part[:, :, 0, :], axis=1)                  # (B, C_IN)
    return kl_sum, keep_cnt, mask_sum, x_sum


# ----------------------------------------------------------------------------
# Full forward (module defaults: dynamic=False, mse_token=False, clf_weight=0,
# ratio_weight=2, distill=0.5)
# ----------------------------------------------------------------------------
def distill_diff_pruning_loss(
    inputs,
    outputs,
    teacher_params,
    ratio_weight=2.0,
    distill_weight=0.5,
    pruning_loc=(3, 6, 9),
    keep_ratio=(0.75, 0.5, 0.25),
    clf_weight=0.0,
    block_tokens=512,
):
    pred, token_pred, mask, out_pred_score = outputs
    B, N, C = token_pred.shape
    W_tok, b_tok, W_cls, b_cls = teacher_params

    # ---- kernel: teacher token head + masked token KL + x column sums ------
    kl_sum, keep_cnt, mask_sum, x_sum = fused_token_distill_and_xsum(
        inputs,                                    # native dtype, no wrapper cast
        W_tok.astype(jnp.bfloat16),
        b_tok.reshape(1, C).astype(jnp.float32),
        token_pred,                                # native dtype, no wrapper cast
        mask.reshape(B, N, 1),
        block_tokens=block_tokens,
    )
    # torch: if mask.sum() < 0.1 -> 0, else batchmean over selected rows.
    token_kl_loss = jnp.where(mask_sum < 0.1, 0.0,
                              kl_sum / jnp.maximum(keep_cnt, 1.0))
    # TODO(synk): mse_token=True and dynamic=True branches are not implemented
    # (module defaults are mse_token=False, dynamic=False).

    # ---- tiny epilogue in plain XLA (per perf review: a Pallas launch cannot
    # win at a few KFLOPs with sub-vreg shapes) ------------------------------
    x_mean = x_sum / jnp.float32(N)                               # (B, C_IN)
    cls_t = x_mean @ W_cls.astype(jnp.float32) + b_cls.astype(jnp.float32)
    lt = _log_softmax(cls_t)
    lp = _log_softmax(pred.astype(jnp.float32))
    cls_kl_loss = jnp.sum(jnp.exp(lt) * (lt - lp)) / B

    scores = jnp.stack(out_pred_score).astype(jnp.float32)       # (S, B, N)
    ratio = jnp.asarray(keep_ratio, jnp.float32).reshape(-1, 1)   # (S, 1)
    pos_ratio = jnp.mean(scores, axis=2)                          # (S, B)
    pred_loss = jnp.sum(jnp.mean((pos_ratio - ratio) ** 2, axis=1))

    # NOTE: the reference forward literally adds self.clf_weight as a constant
    # (no labels / base-criterion term in this variant); matched exactly.
    loss = (
        clf_weight
        + ratio_weight * pred_loss / len(pruning_loc)
        + distill_weight * cls_kl_loss
        + distill_weight * token_kl_loss
    )
    return loss, (pred_loss, cls_kl_loss, token_kl_loss)


# ----------------------------------------------------------------------------
# main
# ----------------------------------------------------------------------------
if __name__ == "__main__":
    B, N, C_IN, C, K = 2, 8, 32, 32, 16   # batch, tokens, in-dim, embed, classes
    S = 3                                 # number of pruning stages

    key = jax.random.PRNGKey(0)
    ks = jax.random.split(key, 9)

    # deterministic synthetic teacher parameters (linear token + cls head)
    W_tok = jax.random.normal(ks[0], (C_IN, C), jnp.float32) * 0.05
    b_tok = jax.random.normal(ks[1], (C,), jnp.float32) * 0.01
    W_cls = jax.random.normal(ks[2], (C_IN, K), jnp.float32) * 0.05
    b_cls = jax.random.normal(ks[3], (K,), jnp.float32) * 0.01
    teacher_params = (W_tok, b_tok, W_cls, b_cls)

    # student outputs + inputs (streamed into the kernel in native dtype)
    inputs = jax.random.normal(ks[4], (B, N, C_IN), jnp.float32)
    pred = jax.random.normal(ks[5], (B, K), jnp.float32)
    token_pred = jax.random.normal(ks[6], (B, N, C), jnp.float32)
    mask = (jax.random.uniform(ks[7], (B, N)) > 0.4).astype(jnp.float32)
    out_pred_score = [
        jax.random.uniform(k, (B, N), jnp.float32)
        for k in jax.random.split(ks[8], S)
    ]

    loss_fn = jax.jit(
        lambda inp, outs: distill_diff_pruning_loss(inp, outs, teacher_params)
    )
    loss, parts = loss_fn(inputs, (pred, token_pred, mask, out_pred_score))
    jax.block_until_ready((loss, parts))
    assert bool(jnp.isfinite(loss))
    print("KERNEL_OK")
</pallas_src>

<mosaic_0001>
module attributes {stable_mosaic.version = 11 : i64} {
  func.func @_token_distill_kernel(%arg0: i32, %arg1: i32, %arg2: memref<1x8x32xf32, #tpu.memory_space<vmem>>, %arg3: memref<32x32xbf16, #tpu.memory_space<vmem>>, %arg4: memref<1x32xf32, #tpu.memory_space<vmem>>, %arg5: memref<1x8x32xf32, #tpu.memory_space<vmem>>, %arg6: memref<1x8x1xf32, #tpu.memory_space<vmem>>, %arg7: memref<1x1x8x128xf32, #tpu.memory_space<vmem>>, %arg8: memref<1x1x8x32xf32, #tpu.memory_space<vmem>>) attributes {dimension_semantics = [#tpu.dimension_semantics<parallel>, #tpu.dimension_semantics<parallel>], iteration_bounds = array<i64: 2, 1>, scalar_prefetch = 0 : i64, scratch_operands = 0 : i64, tpu.core_type = #tpu.core_type<tc>, window_params = [{transform_indices = @transform_0, window_bounds = array<i64: 1, 8, 32>}, {pipeline_mode = #tpu.pipeline_mode<synchronous>, transform_indices = @transform_1, window_bounds = array<i64: 32, 32>}, {pipeline_mode = #tpu.pipeline_mode<synchronous>, transform_indices = @transform_2, window_bounds = array<i64: 1, 32>}, {transform_indices = @transform_3, window_bounds = array<i64: 1, 8, 32>}, {transform_indices = @transform_4, window_bounds = array<i64: 1, 8, 1>}, {transform_indices = @transform_5, window_bounds = array<i64: 1, 1, 8, 128>}, {transform_indices = @transform_6, window_bounds = array<i64: 1, 1, 8, 32>}]} {
    %c8_i32 = arith.constant 8 : i32
    %0 = arith.muli %arg1, %c8_i32 : i32
    %1 = tpu.iota {dimensions = array<i32: 0>} : vector<8x1xi32>
    %2 = vector.broadcast %0 : i32 to vector<8x1xi32>
    %3 = arith.addi %2, %1 : vector<8x1xi32>
    %c8_i32_0 = arith.constant 8 : i32
    %4 = vector.broadcast %c8_i32_0 : i32 to vector<8x1xi32>
    %5 = arith.cmpi slt, %3, %4 : vector<8x1xi32>
    %c0 = arith.constant 0 : index
    %c0_1 = arith.constant 0 : index
    %c0_2 = arith.constant 0 : index
    %6 = vector.load %arg2[%c0, %c0_1, %c0_2] : memref<1x8x32xf32, #tpu.memory_space<vmem>>, vector<1x8x32xf32>
    %7 = vector.shape_cast %6 : vector<1x8x32xf32> to vector<8x32xf32>
    %cst = arith.constant 0.000000e+00 : f32
    %8 = vector.shape_cast %5 : vector<8x1xi1> to vector<8x1xi1>
    %9 = vector.broadcast %8 : vector<8x1xi1> to vector<8x32xi1>
    %10 = vector.broadcast %cst : f32 to vector<8x32xf32>
    %11 = arith.select %9, %7, %10 : vector<8x32xi1>, vector<8x32xf32>
    %cst_3 = arith.constant dense<0.000000e+00> : vector<32xf32>
    %12 = vector.multi_reduction <add>, %11, %cst_3 [0] : vector<8x32xf32> to vector<32xf32>
    %13 = vector.shape_cast %12 : vector<32xf32> to vector<1x32xf32>
    %14 = vector.shape_cast %13 : vector<1x32xf32> to vector<1x32xf32>
    %15 = vector.broadcast %14 : vector<1x32xf32> to vector<8x32xf32>
    %c0_4 = arith.constant 0 : index
    %c0_5 = arith.constant 0 : index
    %c0_6 = arith.constant 0 : index
    %c0_7 = arith.constant 0 : index
    %16 = vector.load %arg8[%c0_4, %c0_5, %c0_6, %c0_7] : memref<1x1x8x32xf32, #tpu.memory_space<vmem>>, vector<1x1x8x32xf32>
    %17 = vector.shape_cast %16 : vector<1x1x8x32xf32> to vector<8x32xf32>
    %18 = vector.shape_cast %15 : vector<8x32xf32> to vector<1x1x8x32xf32>
    tpu.vector_store %arg8[%c0_4, %c0_5, %c0_6, %c0_7], %18 {strides = array<i32>} : memref<1x1x8x32xf32, #tpu.memory_space<vmem>>, vector<1x1x8x32xf32>,
    %c0_8 = arith.constant 0 : index
    %c0_9 = arith.constant 0 : index
    %c0_10 = arith.constant 0 : index
    %19 = vector.load %arg2[%c0_8, %c0_9, %c0_10] : memref<1x8x32xf32, #tpu.memory_space<vmem>>, vector<1x8x32xf32>
    %20 = vector.shape_cast %19 : vector<1x8x32xf32> to vector<8x32xf32>
    %21 = arith.truncf %20 : vector<8x32xf32> to vector<8x32xbf16>
    %c0_11 = arith.constant 0 : index
    %c0_12 = arith.constant 0 : index
    %22 = vector.load %arg3[%c0_11, %c0_12] : memref<32x32xbf16, #tpu.memory_space<vmem>>, vector<32x32xbf16>
    %cst_13 = arith.constant dense<0.000000e+00> : vector<8x32xf32>
    %23 = tpu.matmul %21, %22, %cst_13 {dimension_numbers = #tpu.dot_dimension_numbers<[1], [0], [0], [1], [0, 0, 1, 1], [], []>} : vector<8x32xbf16>, vector<32x32xbf16>, vector<8x32xf32> -> vector<8x32xf32>
    %c0_14 = arith.constant 0 : index
    %c0_15 = arith.constant 0 : index
    %24 = vector.load %arg4[%c0_14, %c0_15] : memref<1x32xf32, #tpu.memory_space<vmem>>, vector<1x32xf32>
    %25 = vector.broadcast %24 : vector<1x32xf32> to vector<8x32xf32>
    %26 = arith.addf %23, %25 : vector<8x32xf32>
    %cst_16 = arith.constant dense<0xFF800000> : vector<8xf32>
    %27 = vector.multi_reduction <maximumf>, %26, %cst_16 [1] : vector<8x32xf32> to vector<8xf32>
    %28 = vector.shape_cast %27 : vector<8xf32> to vector<8x1xf32>
    %29 = vector.broadcast %28 : vector<8x1xf32> to vector<8x32xf32>
    %30 = arith.subf %26, %29 : vector<8x32xf32>
    %31 = math.exp %30 : vector<8x32xf32>
    %cst_17 = arith.constant dense<0.000000e+00> : vector<8xf32>
    %32 = vector.multi_reduction <add>, %31, %cst_17 [1] : vector<8x32xf32> to vector<8xf32>
    %33 = vector.shape_cast %32 : vector<8xf32> to vector<8x1xf32>
    %c0_18 = arith.constant 0 : index
    %c0_19 = arith.constant 0 : index
    %c0_20 = arith.constant 0 : index
    %34 = vector.load %arg5[%c0_18, %c0_19, %c0_20] : memref<1x8x32xf32, #tpu.memory_space<vmem>>, vector<1x8x32xf32>
    %35 = vector.shape_cast %34 : vector<1x8x32xf32> to vector<8x32xf32>
    %cst_21 = arith.constant dense<0xFF800000> : vector<8xf32>
    %36 = vector.multi_reduction <maximumf>, %35, %cst_21 [1] : vector<8x32xf32> to vector<8xf32>
    %37 = vector.shape_cast %36 : vector<8xf32> to vector<8x1xf32>
    %38 = vector.broadcast %37 : vector<8x1xf32> to vector<8x32xf32>
    %39 = arith.subf %35, %38 : vector<8x32xf32>
    %40 = math.exp %39 : vector<8x32xf32>
    %cst_22 = arith.constant dense<0.000000e+00> : vector<8xf32>
    %41 = vector.multi_reduction <add>, %40, %cst_22 [1] : vector<8x32xf32> to vector<8xf32>
    %42 = vector.shape_cast %41 : vector<8xf32> to vector<8x1xf32>
    %43 = math.log %42 : vector<8x1xf32>
    %44 = arith.addf %37, %43 : vector<8x1xf32>
    %45 = arith.mulf %31, %30 : vector<8x32xf32>
    %cst_23 = arith.constant dense<0.000000e+00> : vector<8xf32>
    %46 = vector.multi_reduction <add>, %45, %cst_23 [1] : vector<8x32xf32> to vector<8xf32>
    %47 = vector.shape_cast %46 : vector<8xf32> to vector<8x1xf32>
    %48 = arith.mulf %31, %35 : vector<8x32xf32>
    %cst_24 = arith.constant dense<0.000000e+00> : vector<8xf32>
    %49 = vector.multi_reduction <add>, %48, %cst_24 [1] : vector<8x32xf32> to vector<8xf32>
    %50 = vector.shape_cast %49 : vector<8xf32> to vector<8x1xf32>
    %51 = arith.subf %47, %50 : vector<8x1xf32>
    %52 = arith.divf %51, %33 : vector<8x1xf32>
    %53 = math.log %33 : vector<8x1xf32>
    %54 = arith.subf %52, %53 : vector<8x1xf32>
    %55 = arith.addf %54, %44 : vector<8x1xf32>
    %c0_25 = arith.constant 0 : index
    %c0_26 = arith.constant 0 : index
    %c0_27 = arith.constant 0 : index
    %56 = vector.load %arg6[%c0_25, %c0_26, %c0_27] : memref<1x8x1xf32, #tpu.memory_space<vmem>>, vector<1x8x1xf32>
    %57 = vector.shape_cast %56 : vector<1x8x1xf32> to vector<8x1xf32>
    %cst_28 = arith.constant 0.000000e+00 : f32
    %58 = vector.broadcast %cst_28 : f32 to vector<8x1xf32>
    %59 = arith.select %5, %57, %58 : vector<8x1xi1>, vector<8x1xf32>
    %cst_29 = arith.constant 5.000000e-01 : f32
    %60 = vector.broadcast %cst_29 : f32 to vector<8x1xf32>
    %61 = arith.cmpf ogt, %59, %60 : vector<8x1xf32>
    %62 = arith.andi %61, %5 : vector<8x1xi1>
    %cst_30 = arith.constant 0.000000e+00 : f32
    %63 = vector.broadcast %cst_30 : f32 to vector<8x1xf32>
    %64 = arith.select %62, %55, %63 : vector<8x1xi1>, vector<8x1xf32>
    %65 = vector.shape_cast %64 : vector<8x1xf32> to vector<1x8x1xf32>
    %cst_31 = arith.constant dense<0.000000e+00> : vector<1xf32>
    %66 = vector.multi_reduction <add>, %65, %cst_31 [1, 2] : vector<1x8x1xf32> to vector<1xf32>
    %67 = vector.shape_cast %66 : vector<1xf32> to vector<1x1x1xf32>
    %68 = vector.extract %67[0, 0, 0] : f32 from vector<1x1x1xf32>
    %69 = arith.extui %62 : vector<8x1xi1> to vector<8x1xi32>
    %70 = arith.sitofp %69 : vector<8x1xi32> to vector<8x1xf32>
    %71 = vector.shape_cast %70 : vector<8x1xf32> to vector<1x8x1xf32>
    %cst_32 = arith.constant dense<0.000000e+00> : vector<1xf32>
    %72 = vector.multi_reduction <add>, %71, %cst_32 [1, 2] : vector<1x8x1xf32> to vector<1xf32>
    %73 = vector.shape_cast %72 : vector<1xf32> to vector<1x1x1xf32>
    %74 = vector.extract %73[0, 0, 0] : f32 from vector<1x1x1xf32>
    %75 = vector.shape_cast %59 : vector<8x1xf32> to vector<1x8x1xf32>
    %cst_33 = arith.constant dense<0.000000e+00> : vector<1xf32>
    %76 = vector.multi_reduction <add>, %75, %cst_33 [1, 2] : vector<1x8x1xf32> to vector<1xf32>
    %77 = vector.shape_cast %76 : vector<1xf32> to vector<1x1x1xf32>
    %78 = vector.extract %77[0, 0, 0] : f32 from vector<1x1x1xf32>
    %79 = tpu.iota {dimensions = array<i32: 1>} : vector<8x128xi32>
    %80 = tpu.iota {dimensions = array<i32: 0>} : vector<8x128xi32>
    %c0_i32 = arith.constant 0 : i32
    %81 = vector.broadcast %c0_i32 : i32 to vector<8x128xi32>
    %82 = arith.cmpi eq, %80, %81 : vector<8x128xi32>
    %c0_i32_34 = arith.constant 0 : i32
    %83 = vector.broadcast %c0_i32_34 : i32 to vector<8x128xi32>
    %84 = arith.cmpi eq, %79, %83 : vector<8x128xi32>
    %85 = arith.andi %82, %84 : vector<8x128xi1>
    %c1_i32 = arith.constant 1 : i32
    %86 = vector.broadcast %c1_i32 : i32 to vector<8x128xi32>
    %87 = arith.cmpi eq, %79, %86 : vector<8x128xi32>
    %88 = arith.andi %82, %87 : vector<8x128xi1>
    %c2_i32 = arith.constant 2 : i32
    %89 = vector.broadcast %c2_i32 : i32 to vector<8x128xi32>
    %90 = arith.cmpi eq, %79, %89 : vector<8x128xi32>
    %91 = arith.andi %82, %90 : vector<8x128xi1>
    %cst_35 = arith.constant 0.000000e+00 : f32
    %92 = vector.broadcast %78 : f32 to vector<8x128xf32>
    %93 = vector.broadcast %cst_35 : f32 to vector<8x128xf32>
    %94 = arith.select %91, %92, %93 : vector<8x128xi1>, vector<8x128xf32>
    %95 = vector.broadcast %74 : f32 to vector<8x128xf32>
    %96 = arith.select %88, %95, %94 : vector<8x128xi1>, vector<8x128xf32>
    %97 = vector.broadcast %68 : f32 to vector<8x128xf32>
    %98 = arith.select %85, %97, %96 : vector<8x128xi1>, vector<8x128xf32>
    %c0_36 = arith.constant 0 : index
    %c0_37 = arith.constant 0 : index
    %c0_38 = arith.constant 0 : index
    %c0_39 = arith.constant 0 : index
    %99 = vector.load %arg7[%c0_36, %c0_37, %c0_38, %c0_39] : memref<1x1x8x128xf32, #tpu.memory_space<vmem>>, vector<1x1x8x128xf32>
    %100 = vector.shape_cast %99 : vector<1x1x8x128xf32> to vector<8x128xf32>
    %101 = vector.shape_cast %98 : vector<8x128xf32> to vector<1x1x8x128xf32>
    tpu.vector_store %arg7[%c0_36, %c0_37, %c0_38, %c0_39], %101 {strides = array<i32>} : memref<1x1x8x128xf32, #tpu.memory_space<vmem>>, vector<1x1x8x128xf32>,
    return
  }
  func.func @transform_0(%arg0: i32, %arg1: i32) -> (i32, i32, i32) {
    %c0_i32 = arith.constant 0 : i32
    %c0_i32_0 = arith.constant 0 : i32
    return %arg0, %arg1, %c0_i32 : i32, i32, i32
  }
  func.func @transform_1(%arg0: i32, %arg1: i32) -> (i32, i32) {
    %c0_i32 = arith.constant 0 : i32
    %c0_i32_0 = arith.constant 0 : i32
    %c0_i32_1 = arith.constant 0 : i32
    return %c0_i32, %c0_i32_0 : i32, i32
  }
  func.func @transform_2(%arg0: i32, %arg1: i32) -> (i32, i32) {
    %c0_i32 = arith.constant 0 : i32
    %c0_i32_0 = arith.constant 0 : i32
    %c0_i32_1 = arith.constant 0 : i32
    return %c0_i32, %c0_i32_0 : i32, i32
  }
  func.func @transform_3(%arg0: i32, %arg1: i32) -> (i32, i32, i32) {
    %c0_i32 = arith.constant 0 : i32
    %c0_i32_0 = arith.constant 0 : i32
    return %arg0, %arg1, %c0_i32 : i32, i32, i32
  }
  func.func @transform_4(%arg0: i32, %arg1: i32) -> (i32, i32, i32) {
    %c0_i32 = arith.constant 0 : i32
    %c0_i32_0 = arith.constant 0 : i32
    return %arg0, %arg1, %c0_i32 : i32, i32, i32
  }
  func.func @transform_5(%arg0: i32, %arg1: i32) -> (i32, i32, i32, i32) {
    %c0_i32 = arith.constant 0 : i32
    %c0_i32_0 = arith.constant 0 : i32
    %c0_i32_1 = arith.constant 0 : i32
    return %arg0, %arg1, %c0_i32, %c0_i32_0 : i32, i32, i32, i32
  }
  func.func @transform_6(%arg0: i32, %arg1: i32) -> (i32, i32, i32, i32) {
    %c0_i32 = arith.constant 0 : i32
    %c0_i32_0 = arith.constant 0 : i32
    %c0_i32_1 = arith.constant 0 : i32
    return %arg0, %arg1, %c0_i32, %c0_i32_0 : i32, i32, i32, i32
  }
}

</mosaic_0001>

<bundles_post_ra>
// kernel: _lambda_.1
= control target key start
LH: loop header
LB: loop body
LE: loop exit
PB: predicated region body
PF: predicated region fallthrough
CT: control target
= control target key end

     0   :  { %s810_s21 = smov 0   ;;  %s812_s22 = smov 0   ;;  %s882_s0 = inlined_call_operand.vmem [shape: f32[2,8,32], index: 0, kind: input, shape index: {}]   ;;  %s883_s1 = inlined_call_operand.vmem [shape: bf16[32,32], index: 1, kind: input, shape index: {}]   ;;  %s884_s2 = inlined_call_operand.vmem [shape: f32[1,32], index: 2, kind: input, shape index: {}]   ;;  %s885_s3 = inlined_call_operand.vmem [shape: f32[2,8,32], index: 3, kind: input, shape index: {}]   ;;  %s886_s4 = inlined_call_operand.vmem [shape: f32[2,8,1], index: 4, kind: input, shape index: {}]   ;;  %s887_s5 = inlined_call_operand.vmem [shape: f32[2,1,8,128], index: 5, kind: output, shape index: {0}]   ;;  %s888_s6 = inlined_call_operand.vmem [shape: f32[2,1,8,32], index: 6, kind: output, shape index: {1}]  }
   0x1   :  { %s814_s23 = smov 0  }
   0x2 LB: > { %s29_s24 = sadd.s32 1, %s767_s22  ;;  %p681_p0 = scmp.ge.s32.totalorder %s771_s23, 1  ;;  %s771_s23 = sphi %s814_s23, %s17_s23   ;;  %s767_s22 = sphi %s812_s22, %s890_s22   ;;  %s763_s21 = sphi %s810_s21, %s889_s21  }
   0x3   : > { %p31_p1 = scmp.ge.s32.totalorder %s29_s24, 2  ;;  %p263_p2 = scmp.lt.s32.totalorder %s771_s23, 3 }
   0x5   : > { %s892_s24 = smov (%p31_p1, %s29_s24), 0  ;;  %p264_p3 = pnand %p681_p0, %p263_p2 }
   0x6   : > { %v737_v0 = vld [vmem:[%s883_s1] sm:$0xff] (!%p264_p3)   ;;  %v773_v1 = vmov (!%p264_p3), 0.0   ;;  %v738_v2 = vld [vmem:[%s883_s1 + $0x8] sm:$0xff] (!%p264_p3)   ;;  %vm774_vm0 = vmmov (!%p264_p3), 0   ;;  %p318_p4 = scmp.lt.s32.totalorder (!%p264_p3), %s763_s21, 1  ;;  %vm364_vm1 = vcmask (!%p264_p3), 261120  }
   0x7   : > { %267 = sbr.rel (%p264_p3) target bundleno = 771 (0x303), region = 40  ;;  %697 = vmatprep.subr.bf16.mxu0 (!%p264_p3), %v773_v1  ;;  %701 = vmatprep.mubr.msk.bf16.mxu0 (!%p264_p3), %vm774_vm0, %v773_v1  ;;  %v687_v12 = vld [vmem:[%s884_s2] ss:$0 sm:$0xff] (!%p264_p3)  ;;  %vm483_vm2 = vcmask (!%p264_p3), 7168  }
   0x8   : > { %698 = vmatpush3.bf16.msra.mxu0 (!%p264_p3), %v737_v0 }
   0x9   : > { %699 = vmatprep.subr.bf16.mxu0 (!%p264_p3), %v773_v1 }
   0xc   : > { %700 = vmatpush3.bf16.msra.mxu0 (!%p264_p3), %v738_v2 }
   0xe   : > { %s894_s21 = smov (!%p318_p4, %s763_s21), 1 }
   0xf   : > { %s834_s29 = sshll.u32 %s894_s21, 3 }
  0x10   : > { %s324_s8 = scalar_lea.vmem %s882_s0, %s834_s29  ;;  %s352_s11 = scalar_lea.vmem %s888_s6, %s834_s29 }
  0x11   : > { %v360_v3 = vld [vmem:[%s324_s8] sm:$0xff]  ;;  %s331_s16 = scalar_lea.vmem %s885_s3, %s834_s29  ;;  %s338_s19 = scalar_lea.vmem %s886_s4, %s834_s29 }
  0x12   : > { %v365_v4 = vsel %vm364_vm1, %v360_v3, 0.0  ;;  %v374_v5 = vpack.c.bf16 %v360_v3, %v360_v3  ;;  %v450_v17 = vld [vmem:[%s331_s16] sm:$0xff]  ;;  %s345_s28 = scalar_lea.vmem %s887_s5, %s834_s29 }
  0x13   : > { %v366_v6 = vrot.slane %v365_v4, 4  ;;  %v451_v20 = vsel %vm364_vm1, %v450_v17, -inf  ;;  %v478_v35 = vld [vmem:[%s338_s19] sm:$0xff] }
  0x14   : > { %702 = vmatmul.mubr.msk.bf16.vlgmr.msra.gmra.mrb[0].mxu0 %vm364_vm1, %v374_v5  ;;  %vm480_vm3 = vcmp.gt.f32.partialorder %v478_v35, 0.5  ;;  %v506_v54 = vsel %vm483_vm2, %v478_v35, 0.0 }
  0x15   : > { %v367_v7 = vadd.f32 %v366_v6, %v365_v4  ;;  %v691_v36 = vsel %vm480_vm3, 1.0, %v773_v1 }
  0x16   : > { %v496_v37 = vsel %vm483_vm2, %v691_v36, 0.0 }
  0x17   : > { %v368_v8 = vrot.slane %v367_v7, 2 }
  0x19   : > { %v369_v9 = vadd.f32 %v368_v8, %v367_v7 }
  0x1b   : > { %v370_v10 = vrot.slane %v369_v9, 1 }
  0x1d   : > { %v371_v11 = vadd.f32 %v370_v10, %v369_v9 }
  0x1f   : > { %372 = vst.msk [vmem:[%s352_s11] sm:$0xff] %vm364_vm1, %v371_v11 }
  0xe7   : > { %v435_v13 = vpop.f32.mrb[0].mxu0 }
  0xe8   : > { %v436_v14 = vadd.f32 %v687_v12, %v435_v13  ;;  %v703_v15 = vpop.f32.mrb[1].mxu0  ;;  %v355_v12 = vlaneseq }
  0xe9   : > { %v438_v16 = vpop.f32.mrb[2].mxu0 }
  0xea   : > { %v704_v18 = vpop.f32.mrb[3].mxu0  ;;  %v441_v19 = vsel %vm364_vm1, %v436_v14, -inf  ;;  %v356_v13 = vshrl.u32 %v355_v12, 7 }
  0xeb   : > { %442 = vmax.xlane.f32.xlu0 %v441_v19 }
  0xec   : > { %vm518_vm4 = vcmp.eq.s32.totalorder %v356_v13, 0 }
  0xef   : > { %452 = vmax.xlane.f32.xlu0 %v451_v20 }
 0x178   : > { %v443_v21 = vpop.xlane.xlu0 %442 }
 0x179   : > { %v444_v22 = vsub.f32 %v436_v14, %v443_v21  ;;  %v517_v14 = vand.u32 127, %v355_v12 }
 0x17b   : > { %v445_v23 = vmul.f32 1.442695, %v444_v22  ;;  %vm523_vm5 = vcmp.eq.s32.totalorder %v517_v14, 2  ;;  %vm521_vm6 = vcmp.eq.s32.totalorder %v517_v14, 1  ;;  %vm519_vm7 = vcmp.eq.s32.totalorder %v517_v14, 0 }
 0x17c   : > { %v453_v24 = vpop.xlane.xlu0 %452  ;;  %vm524_vm8 = vmand %vm518_vm4, %vm523_vm5 }
 0x17d   : > { %739 = vpow2.f32 %v445_v23  ;;  %v454_v25 = vsub.f32 %v450_v17, %v453_v24  ;;  %vm522_vm9 = vmand %vm518_vm4, %vm521_vm6 }
 0x17e   : > { %vm520_vm10 = vmand %vm518_vm4, %vm519_vm7 }
 0x17f   : > { %v455_v26 = vmul.f32 1.442695, %v454_v25 }
 0x181   : > { %741 = vpow2.f32 %v455_v26 }
 0x187   : > { %v740_v27 = vpop.eup %739 }
 0x188   : > { %v447_v28 = vsel %vm364_vm1, %v740_v27, 0.0  ;;  %v463_v29 = vmul.f32 %v740_v27, %v444_v22  ;;  %v467_v33 = vmul.f32 %v740_v27, %v450_v17 }
 0x189   : > { %448 = vadd.xlane.f32.xlu1 %v447_v28 }
 0x18a   : > { %v464_v30 = vsel %vm364_vm1, %v463_v29, 0.0  ;;  %v468_v34 = vsel %vm364_vm1, %v467_v33, 0.0 }
 0x18b   : > { %v742_v31 = vpop.eup %741  ;;  %465 = vadd.xlane.f32.xlu0 %v464_v30 }
 0x18c   : > { %v457_v32 = vsel %vm364_vm1, %v742_v31, 0.0 }
 0x18d   : > { %458 = vadd.xlane.f32.xlu1 %v457_v32 }
 0x191   : > { %469 = vadd.xlane.f32.xlu1 %v468_v34 }
 0x195   : > { %497 = vadd.xlane.f32.xlu1 %v496_v37 }
 0x216   : > { %v449_v38 = vpop.xlane.xlu1 %448 }
 0x217   : > { %743 = vrcp.f32 %v449_v38 }
 0x218   : > { %745 = vlog2.f32 %v449_v38  ;;  %v466_v41 = vpop.xlane.xlu0 %465 }
 0x21a   : > { %v459_v39 = vpop.xlane.xlu1 %458 }
 0x21b   : > { %747 = vlog2.f32 %v459_v39 }
 0x21e   : > { %v470_v40 = vpop.xlane.xlu1 %469 }
 0x21f   : > { %v471_v42 = vsub.f32 %v466_v41, %v470_v40 }
 0x221   : > { %v744_v43 = vpop.eup %743 }
 0x222   : > { %v746_v44 = vpop.eup %745  ;;  %v473_v46 = vmul.f32 %v744_v43, %v471_v42  ;;  %v498_v55 = vpop.xlane.xlu1 %497 }
 0x223   : > { %v475_v45 = vmul.f32 0.6931472, %v746_v44  ;;  %v499_v56 = vrot.slane %v498_v55, 4 }
 0x225   : > { %v748_v47 = vpop.eup %747  ;;  %v476_v50 = vsub.f32 %v473_v46, %v475_v45  ;;  %v500_v57 = vadd.f32 %v499_v56, %v498_v55 }
 0x226   : > { %v461_v48 = vmul.f32 0.6931472, %v748_v47 }
 0x227   : > { %v501_v58 = vrot.slane %v500_v57, 2 }
 0x228   : > { %v462_v49 = vadd.f32 %v461_v48, %v453_v24 }
 0x229   : > { %v502_v62 = vadd.f32 %v501_v58, %v500_v57 }
 0x22a   : > { %v477_v51 = vadd.f32 %v476_v50, %v462_v49 }
 0x22b   : > { %v503_v4 = vrot.slane %v502_v62, 1 }
 0x22c   : > { %v482_v52 = vsel %vm480_vm3, %v477_v51, 0.0 }
 0x22d   : > { %v484_v53 = vsel %vm483_vm2, %v482_v52, 0.0  ;;  %v504_v9 = vadd.f32 %v503_v4, %v502_v62 }
 0x22e   : > { %485 = vadd.xlane.f32.xlu0 %v484_v53 }
 0x232   : > { %507 = vadd.xlane.f32.xlu0 %v506_v54 }
 0x2bb   : > { %v486_v59 = vpop.xlane.xlu0 %485 }
 0x2bc   : > { %v487_v60 = vrot.slane %v486_v59, 4 }
 0x2be   : > { %v488_v61 = vadd.f32 %v487_v60, %v486_v59 }
 0x2bf   : > { %v508_v63 = vpop.xlane.xlu0 %507 }
 0x2c0   : > { %v489_v0 = vrot.slane %v488_v61, 2  ;;  %v509_v1 = vrot.slane %v508_v63, 4 }
 0x2c2   : > { %v510_v2 = vadd.f32 %v509_v1, %v508_v63  ;;  %v490_v3 = vadd.f32 %v489_v0, %v488_v61 }
 0x2c4   : > { %v511_v5 = vrot.slane %v510_v2, 2  ;;  %v491_v6 = vrot.slane %v490_v3, 1 }
 0x2c6   : > { %v512_v7 = vadd.f32 %v511_v5, %v510_v2  ;;  %v492_v8 = vadd.f32 %v491_v6, %v490_v3 }
 0x2c8   : > { %705 = vpush %v492_v8  ;;  %v513_v10 = vrot.slane %v512_v7, 1 }
 0x2c9   : > { %707 = vpush %v504_v9 }
 0x2ca   : > { %v514_v11 = vadd.f32 %v513_v10, %v512_v7 }
 0x2cc   : > { %709 = vpush %v514_v11 }
 0x2f9   : > { %s706_s20 = spop %705 }
 0x2fa   : > { %s708_s21 = spop %707  ;;  %v529_v18 = vstv %s706_s20 }
 0x2fb   : > { %v527_v16 = vstv %s708_s21 }
 0x2fd   : > { %s710_s25 = spop %709 }
 0x2fe   : > { %v525_v15 = vstv %s710_s25 }
 0x2ff   : > { %v526_v17 = vsel %vm524_vm8, %v525_v15, 0.0 }
 0x300   : > { %v528_v19 = vsel %vm522_vm9, %v527_v16, %v526_v17 }
 0x301   : > { %v530_v20 = vsel %vm520_vm10, %v529_v18, %v528_v19 }
 0x302   : > { %531 = vst [vmem:[%s345_s28] sm:$0xff] %v530_v20 }
 0x303 PF: > { %s17_s23 = sadd.s32 1, %s771_s23   ;;  %s889_s21 = smov %s767_s22 }
 0x304   : > { %p14_p5 = scmp.ge.s32.totalorder %s17_s23, 4   ;;  %s890_s22 = smov %s892_s24 }
 0x306   :  { %16 = sbr.rel (!%p14_p5) target bundleno = 2 (0x2), region = 88 }

</bundles_post_ra>
